<compile_context>
chip_gen: v5e
topology: v5e:2x2
jax: 0.10.0
libtpu: 0.0.40
codegen_flags: <defaults>
</compile_context>

<pallas_src>
import jax
import jax.numpy as jnp
from jax.experimental import pallas as pl
from jax.experimental.pallas import tpu as pltpu


_PALLAS_MIN_BYTES = 1 << 20  # below this, XLA's fused elementwise already hits the roofline


def _relu_kernel(x_ref, o_ref):
    """threshold is None path: o = max(x, 0)."""
    o_ref[...] = jnp.maximum(x_ref[...], 0)


def _clamped_relu_kernel(thr_ref, x_ref, o_ref):
    """Thresholded path: o = min(max(x, 0), thr). thr_ref is an SMEM (1,) f32 scalar."""
    x = x_ref[...]
    thr = thr_ref[0].astype(x.dtype)
    o_ref[...] = jnp.minimum(jnp.maximum(x, 0), thr)


def _vmem_capacity_bytes():
    try:
        return int(pltpu.get_tpu_info().vmem_capacity_bytes)
    except Exception:
        return 64 << 20  # conservative fallback (v7x per-TensorCore VMEM)


def spike_relu(x, threshold=None, quantize=False, force_pallas=False):
    """JAX/Pallas equivalent of SpikeReLU.forward for dense (non-SpikeTensor) inputs.

    x: float array of any shape (e.g. NCHW activations).
    threshold: python float, jnp scalar, or None.
    quantize: kept for API parity; unused in forward (matches the PyTorch module).
    force_pallas: skip the small-tensor fallback (used to exercise the kernel in tests).
    """
    # TODO(synk): SpikeTensor pass-through branch not representable (no SpikeTensor type in JAX).
    del quantize  # unused in the PyTorch forward as well

    orig_shape = x.shape
    dtype = x.dtype
    itemsize = jnp.dtype(dtype).itemsize
    total = x.size

    # ---- Small-tensor fallback: Pallas launch/per-step overhead dominates here. ----
    if total * itemsize < _PALLAS_MIN_BYTES and not force_pallas:
        y = jnp.maximum(x, 0)
        if threshold is not None:
            y = jnp.minimum(y, jnp.asarray(threshold).astype(dtype))
        return y

    # ---- Lane-dense slab layout: (rows, cols) with cols a multiple of 128. ----
    cols = 512 if total >= 512 else 128
    rows = pl.cdiv(total, cols)

    # Dtype-aware sublane multiple: 8 f32 / 16 bf16 / 32 int8-fp8.
    sub = max(8, 32 // itemsize)

    # Generation-aware block sizing: ~VMEM/16 per block -> double-buffered in+out is
    # ~4x that resident.  v5e/v6e (128 MiB VMEM) -> 8 MiB blocks (32 MiB resident);
    # v7x (64 MiB per TC) -> 4 MiB blocks (16 MiB resident).
    vmem_cap = _vmem_capacity_bytes()
    target_block_bytes = min(8 << 20, max(1 << 20, vmem_cap // 16))
    row_bytes = cols * itemsize

    if rows <= sub:
        # Full row extent: legal block shape even when rows is not a multiple of `sub`.
        block_rows = rows
    else:
        block_rows = max(sub, (min(rows, target_block_bytes // row_bytes) // sub) * sub)
        # Megacore (v7x, 2 TCs): make sure the "parallel" grid has >= 2 steps so both
        # cores get work; costs only one extra ~0.35us step on single-TC chips.
        if pl.cdiv(rows, block_rows) < 2 and rows >= 2 * sub:
            block_rows = max(sub, ((rows // 2) // sub) * sub)

    num_blocks = pl.cdiv(rows, block_rows)

    # Pad only to a multiple of `cols` (needed for the free (rows, cols) reshape).
    # The ragged final row-block (rows % block_rows != 0) is masked by Pallas, so no
    # padding up to a block_rows multiple and — in the aligned common case — no pad at all.
    padded_total = rows * cols
    flat = x.reshape(-1)
    if padded_total != total:
        flat = jnp.pad(flat, (0, padded_total - total))
    x2d = flat.reshape(rows, cols)

    block_bytes = block_rows * cols * itemsize
    vmem_limit = int(min(vmem_cap // 2, max(32 << 20, 4 * block_bytes + (4 << 20))))
    compiler_params = pltpu.CompilerParams(
        dimension_semantics=("parallel",),
        vmem_limit_bytes=vmem_limit,
    )

    x_spec = pl.BlockSpec((block_rows, cols), lambda i: (i, 0))
    out_spec = pl.BlockSpec((block_rows, cols), lambda i: (i, 0))
    out_shape = jax.ShapeDtypeStruct((rows, cols), dtype)

    if threshold is None:
        out2d = pl.pallas_call(
            _relu_kernel,
            out_shape=out_shape,
            grid_spec=pltpu.PrefetchScalarGridSpec(
                num_scalar_prefetch=0,
                grid=(num_blocks,),
                in_specs=[x_spec],
                out_specs=out_spec,
            ),
            compiler_params=compiler_params,
        )(x2d)
    else:
        # SMEM scalar threshold: accepts traced values (inside jit/grad) and reuses the
        # same compiled kernel when only the threshold value changes.
        thr_arr = jnp.asarray(threshold, dtype=jnp.float32).reshape(1)
        out2d = pl.pallas_call(
            _clamped_relu_kernel,
            out_shape=out_shape,
            grid_spec=pltpu.PrefetchScalarGridSpec(
                num_scalar_prefetch=0,
                grid=(num_blocks,),
                in_specs=[
                    pl.BlockSpec(memory_space=pltpu.MemorySpace.SMEM),  # threshold scalar
                    x_spec,                                             # input slab tile
                ],
                out_specs=out_spec,
            ),
            compiler_params=compiler_params,
        )(thr_arr, x2d)

    if padded_total != total:
        # NOTE: with a negative threshold the zero-padded tail comes back as `thr`, not 0;
        # it is sliced off here, so results stay correct. Keep this slice if padding exists.
        return out2d.reshape(-1)[:total].reshape(orig_shape)
    return out2d.reshape(orig_shape)


if __name__ == "__main__":
    key = jax.random.PRNGKey(0)

    # Small NCHW input consistent with a conv-activation use of SpikeReLU.
    x = jax.random.normal(key, (2, 4, 16, 16), dtype=jnp.float32)
    threshold = 0.75

    # Pallas path (forced, since the demo tensors are below the small-tensor fallback).
    y_thresh = jax.block_until_ready(spike_relu(x, threshold=threshold, force_pallas=True))
    y_relu = jax.block_until_ready(spike_relu(x, threshold=None, force_pallas=True))

    ref_thresh = jnp.minimum(jnp.maximum(x, 0.0), threshold)
    ref_relu = jnp.maximum(x, 0.0)
    assert jnp.allclose(y_thresh, ref_thresh), "threshold path mismatch"
    assert jnp.allclose(y_relu, ref_relu), "relu path mismatch"

    # Odd, non-lane-aligned spatial shape (7x7) exercises the flatten+pad+slice path.
    x_odd = jax.random.normal(jax.random.PRNGKey(0), (2, 3, 7, 7), dtype=jnp.float32)
    y_odd = jax.block_until_ready(spike_relu(x_odd, threshold=threshold, force_pallas=True))
    ref_odd = jnp.minimum(jnp.maximum(x_odd, 0.0), threshold)
    assert jnp.allclose(y_odd, ref_odd), "odd-shape path mismatch"

    # Small-tensor fallback path (no pallas_call) still matches the reference.
    y_small = jax.block_until_ready(spike_relu(x, threshold=threshold))
    assert jnp.allclose(y_small, ref_thresh), "small-tensor fallback mismatch"

    print("KERNEL_OK")
</pallas_src>

<mosaic_0001>
module attributes {stable_mosaic.version = 11 : i64} {
  func.func @_clamped_relu_kernel(%arg0: i32, %arg1: memref<1xf32, #tpu.memory_space<smem>>, %arg2: memref<4x512xf32, #tpu.memory_space<vmem>>, %arg3: memref<4x512xf32, #tpu.memory_space<vmem>>) attributes {dimension_semantics = [#tpu.dimension_semantics<parallel>], iteration_bounds = array<i64: 1>, scalar_prefetch = 0 : i64, scratch_operands = 0 : i64, tpu.core_type = #tpu.core_type<tc>, window_params = [{transform_indices = @transform_0, window_bounds = array<i64: 1>}, {transform_indices = @transform_1, window_bounds = array<i64: 4, 512>}, {transform_indices = @transform_2, window_bounds = array<i64: 4, 512>}]} {
    %c0 = arith.constant 0 : index
    %c0_0 = arith.constant 0 : index
    %0 = vector.load %arg2[%c0, %c0_0] : memref<4x512xf32, #tpu.memory_space<vmem>>, vector<4x512xf32>
    %c0_1 = arith.constant 0 : index
    %1 = memref.load %arg1[%c0_1] : memref<1xf32, #tpu.memory_space<smem>>
    %cst = arith.constant 0.000000e+00 : f32
    %2 = vector.broadcast %cst : f32 to vector<4x512xf32>
    %3 = arith.maximumf %0, %2 : vector<4x512xf32>
    %4 = vector.broadcast %1 : f32 to vector<4x512xf32>
    %5 = arith.minimumf %3, %4 : vector<4x512xf32>
    %c0_2 = arith.constant 0 : index
    %c0_3 = arith.constant 0 : index
    %6 = vector.load %arg3[%c0_2, %c0_3] : memref<4x512xf32, #tpu.memory_space<vmem>>, vector<4x512xf32>
    tpu.vector_store %arg3[%c0_2, %c0_3], %5 {strides = array<i32>} : memref<4x512xf32, #tpu.memory_space<vmem>>, vector<4x512xf32>,
    return
  }
  func.func @transform_0(%arg0: i32) -> i32 {
    %c0_i32 = arith.constant 0 : i32
    %c0_i32_0 = arith.constant 0 : i32
    return %c0_i32 : i32
  }
  func.func @transform_1(%arg0: i32) -> (i32, i32) {
    %c0_i32 = arith.constant 0 : i32
    %c0_i32_0 = arith.constant 0 : i32
    return %arg0, %c0_i32 : i32, i32
  }
  func.func @transform_2(%arg0: i32) -> (i32, i32) {
    %c0_i32 = arith.constant 0 : i32
    %c0_i32_0 = arith.constant 0 : i32
    return %arg0, %c0_i32 : i32, i32
  }
}

</mosaic_0001>

<bundles_post_ra>
// kernel: tpu_custom_call.1
= control target key start
LH: loop header
LB: loop body
LE: loop exit
PB: predicated region body
PF: predicated region fallthrough
CT: control target
= control target key end

     0   :  { %8 = vsyncpa [#allocation4], 0  ;;  %s134_s0 = inlined_call_operand.<no memory space> [shape: f32[1], index: 0, kind: input, shape index: {}]   ;;  %s135_s1 = inlined_call_operand.hbm [shape: f32[4,512], index: 1, kind: input, shape index: {}]   ;;  %s136_s2 = inlined_call_operand.hbm [shape: f32[4,512], index: 2, kind: output, shape index: {}]  }
   0x1   :  { %9 = vsyncpa [#allocation5], 0  ;;  %s17_s11 = sshll.u32 %s135_s1, 4  ;;  %s108_s12 = smov [#allocation3]   ;;  %s18_s11 = int_to_ptr.hbm [resolvable:$true] %s17_s11 }
   0x2   :  { %s19_s13 = sshll.u32 %s108_s12, 4  ;;  %s20_s13 = int_to_ptr.vmem [resolvable:$true] %s19_s13 }
   0x3   :  { %22 = dma.hbm_to_vmem [thread:$0]  %s18_s11, 256, %s20_s13, [#allocation4]  }
   0x4   :  { %104 = dma.done.wait [#allocation4], 256  }
   0x5   :  { %105 = vsyncadd [#allocation4], 4294967040  ;;  %v27_v0 = vld [vmem:[#allocation3] sm:$0xff]  ;;  %v32_v1 = vstv %s134_s0  ;;  %v28_v2 = vld [vmem:[#allocation3 + $0x8] sm:$0xff]  ;;  %s109_s16 = smov [#allocation6]   ;;  %s44_s1 = sshll.u32 %s136_s2, 4  ;;  %s45_s1 = int_to_ptr.hbm [resolvable:$true] %s44_s1 }
   0x6   :  { %v30_v3 = vmax.f32 %v27_v0, 0.0  ;;  %v31_v4 = vmax.f32 %v28_v2, 0.0  ;;  %s42_s17 = sshll.u32 %s109_s16, 4  ;;  %s43_s17 = int_to_ptr.vmem [resolvable:$true] %s42_s17 }
   0x8   :  { %v33_v5 = vmin.f32 %v30_v3, %v32_v1  ;;  %v34_v6 = vmin.f32 %v31_v4, %v32_v1 }
   0xa   :  { %35 = vst [vmem:[#allocation6] sm:$0xff] %v33_v5 }
   0xb   :  { %36 = vst [vmem:[#allocation6 + $0x8] sm:$0xff] %v34_v6 }
   0xc   :  { %47 = dma.vmem_to_hbm [thread:$0]  %s43_s17, 256, %s45_s1, [#allocation5]  }
   0xd   :  { %106 = dma.done.wait [#allocation5], 256  }
   0xe   :  { %107 = vsyncadd [#allocation5], 4294967040 }
   0xf   :  { %52 = vsyncpa [#allocation4], 1 }
  0x10   :  { %53 = vsyncpa [#allocation5], 1 }

</bundles_post_ra>
